<compile_context>
chip_gen: v5e
topology: v5e:2x2
jax: 0.10.0
libtpu: 0.0.40
codegen_flags: <defaults>
</compile_context>

<pallas_src>
import functools

import numpy as np

import jax
import jax.numpy as jnp
from jax.experimental import pallas as pl
from jax.experimental.pallas import tpu as pltpu

LEAKY_SLOPE = 0.1
BN_EPS = 1e-5

NET = {"height": 16, "width": 16, "channels": 4}

# Synthetic stand-in for utils.parse_config()[1:] — covers every layer type
# handled in Yolo.forward().
CONFIG = [
    {"type": "convolutional", "filters": 8, "size": 3, "stride": 1, "pad": 1,
     "bn": True, "activation": "leaky"},                                   # 0: 8 x 16x16
    {"type": "convolutional", "filters": 16, "size": 3, "stride": 2, "pad": 1,
     "bn": True, "activation": "leaky"},                                   # 1: 16 x 8x8
    {"type": "convolutional", "filters": 16, "size": 1, "stride": 1, "pad": 0,
     "bn": True, "activation": "leaky"},                                   # 2: 16 x 8x8
    {"type": "shortcut", "from": -2},                                      # 3: 16 x 8x8
    {"type": "convolutional", "filters": 16, "size": 1, "stride": 1, "pad": 0,
     "bn": False, "activation": "linear"},                                 # 4: head (2 anchors * 8)
    {"type": "yolo", "anchors": [(10, 14), (23, 27)], "classes": 3},       # 5: detections (B,128,8)
    {"type": "route", "layers": "3"},                                      # 6: 16 x 8x8
    {"type": "convolutional", "filters": 8, "size": 1, "stride": 1, "pad": 0,
     "bn": True, "activation": "leaky"},                                   # 7: 8 x 8x8
    {"type": "upsample", "stride": 2},                                     # 8: 8 x 16x16
    {"type": "route", "layers": "-1,-9"},                                  # 9: 16 x 16x16
    {"type": "convolutional", "filters": 16, "size": 1, "stride": 1, "pad": 0,
     "bn": False, "activation": "linear"},                                 # 10: head
    {"type": "yolo", "anchors": [(3, 5), (7, 9)], "classes": 3},           # 11: detections (B,512,8)
]

_VMEM = pl.BlockSpec(memory_space=pltpu.MemorySpace.VMEM)
# 32 MiB fits the scoped defaults on v5e/v6e (128 MiB phys) and v7x (64 MiB phys).
_VMEM_LIMIT = 32 * 1024 * 1024


# ----------------------------- kernel helpers --------------------------------

def _leaky(x):
    # max(x, 0.1*x): one mul + one max instead of compare+select+mul.
    return jnp.maximum(x, LEAKY_SLOPE * x)


def _yolo_epilogue(acc, sign, is_exp, mul, xsel, ysel, xy):
    """Full-tile YOLO transform on a (C, M) tile (no per-row slicing / concat).

    sign   (C,1): +1 for w/h rows (exp), -1 for sigmoid rows.
    is_exp (C,1): 1.0 for w/h rows, else 0.0.
    mul    (C,1): stride for x/y rows, anchor w/h for w/h rows, 1 otherwise.
    xsel/ysel (C,1): select which rows get the x / y grid offsets.
    xy     (2,M): row0 = x_offset*stride, row1 = y_offset*stride.
    """
    e = jnp.exp(acc * sign)                          # EUP, whole tile
    sig = pl.reciprocal(1.0 + e, approx=True)        # sigmoid = 1/(1+exp(-acc))
    cond = jnp.broadcast_to(is_exp, acc.shape) > 0.5
    val = jnp.where(cond, e, sig)
    add = xy[0:1, :] * xsel + xy[1:2, :] * ysel
    return val * mul + add


# ------------------------------ Pallas kernels --------------------------------

def _conv_leaky_kernel(p_ref, w_ref, b_ref, o_ref):
    """(Cout, tn) = W @ patches + bias, LeakyReLU, lane-dense bf16 store."""
    acc = jnp.dot(w_ref[...], p_ref[...], preferred_element_type=jnp.float32)
    acc = acc + b_ref[...]
    o_ref[...] = _leaky(acc).astype(o_ref.dtype)


def _mid_block_kernel(p1_ref, w1_ref, b1_ref, w2_ref, b2_ref, w47_ref, b47_ref,
                      sign_ref, isexp_ref, mul_ref, xsel_ref, ysel_ref, xy_ref,
                      det_ref, x7_ref, *, head_rows):
    """conv1(3x3,im2col'd) -> conv2(1x1) -> shortcut -> stacked {conv4 head, conv7}.

    All intermediates stay in VMEM/vregs; outputs: YOLO head-1 detections (f32)
    and conv7 activations (bf16)."""
    x1 = _leaky(jnp.dot(w1_ref[...], p1_ref[...],
                        preferred_element_type=jnp.float32) + b1_ref[...])
    x2 = _leaky(jnp.dot(w2_ref[...], x1.astype(jnp.bfloat16),
                        preferred_element_type=jnp.float32) + b2_ref[...])
    x3 = (x2 + x1).astype(jnp.bfloat16)              # shortcut (layer 3)
    s = jnp.dot(w47_ref[...], x3,
                preferred_element_type=jnp.float32) + b47_ref[...]
    det_ref[...] = _yolo_epilogue(s[:head_rows, :], sign_ref[...], isexp_ref[...],
                                  mul_ref[...], xsel_ref[...], ysel_ref[...],
                                  xy_ref[...])
    x7_ref[...] = _leaky(s[head_rows:, :]).astype(x7_ref.dtype)


def _route_head_kernel(xa_ref, xb_ref, wa_ref, wb_ref, b_ref,
                       sign_ref, isexp_ref, mul_ref, xsel_ref, ysel_ref, xy_ref,
                       det_ref):
    """route(-1,-9) + 1x1 head conv + YOLO transform, weight split along Cin."""
    acc = jnp.dot(wa_ref[...], xa_ref[...], preferred_element_type=jnp.float32)
    acc = acc + jnp.dot(wb_ref[...], xb_ref[...], preferred_element_type=jnp.float32)
    acc = acc + b_ref[...]
    det_ref[...] = _yolo_epilogue(acc, sign_ref[...], isexp_ref[...],
                                  mul_ref[...], xsel_ref[...], ysel_ref[...],
                                  xy_ref[...])


# ------------------------------- wrappers -------------------------------------

def _pick_tile(m):
    # Prefer >=2 steps of a lane-dense 128-multiple so the "parallel" grid axis
    # gives v7x's second TensorCore work; otherwise a single full block.
    for t in (256, 128):
        if m % t == 0 and m // t >= 2:
            return t
    return m


def conv_leaky(patches, w, b, cout):
    """patches: (Kdim, M) bf16; w: (Cout, Kdim) bf16; b: (Cout,1) f32 -> (Cout,M) bf16."""
    kdim, m = patches.shape
    tn = _pick_tile(m)
    tiled = lambda i: (0, i)
    resident = lambda i: (0, 0)
    return pl.pallas_call(
        _conv_leaky_kernel,
        out_shape=jax.ShapeDtypeStruct((cout, m), jnp.bfloat16),
        grid=(m // tn,),
        in_specs=[pl.BlockSpec((kdim, tn), tiled),
                  pl.BlockSpec((cout, kdim), resident),
                  pl.BlockSpec((cout, 1), resident)],
        out_specs=pl.BlockSpec((cout, tn), tiled),
        compiler_params=pltpu.CompilerParams(
            dimension_semantics=("parallel",),
            vmem_limit_bytes=_VMEM_LIMIT),
    )(patches, w, b)


def mid_block(p1, w1, b1, w2, b2, w47, b47, consts, head_rows, c7):
    """One pallas_call for layers 1-7 (conv1, conv2, shortcut, head conv4 + conv7)."""
    m = p1.shape[1]
    sign, isexp, mul, xsel, ysel, xy = consts
    return pl.pallas_call(
        functools.partial(_mid_block_kernel, head_rows=head_rows),
        out_shape=(jax.ShapeDtypeStruct((head_rows, m), jnp.float32),
                   jax.ShapeDtypeStruct((c7, m), jnp.bfloat16)),
        in_specs=[_VMEM] * 13,
        out_specs=(_VMEM, _VMEM),
        compiler_params=pltpu.CompilerParams(vmem_limit_bytes=_VMEM_LIMIT),
    )(p1, w1, b1, w2, b2, w47, b47, sign, isexp, mul, xsel, ysel, xy)


def route_head(xa, xb, wa, wb, b, consts):
    """One pallas_call for layers 9-11 (route concat folded into a split matmul)."""
    ca, m = xa.shape
    cb = xb.shape[0]
    cout = wa.shape[0]
    sign, isexp, mul, xsel, ysel, xy = consts
    tn = _pick_tile(m)
    tiled = lambda i: (0, i)
    resident = lambda i: (0, 0)
    return pl.pallas_call(
        _route_head_kernel,
        out_shape=jax.ShapeDtypeStruct((cout, m), jnp.float32),
        grid=(m // tn,),
        in_specs=[pl.BlockSpec((ca, tn), tiled),
                  pl.BlockSpec((cb, tn), tiled),
                  pl.BlockSpec((cout, ca), resident),
                  pl.BlockSpec((cout, cb), resident),
                  pl.BlockSpec((cout, 1), resident),
                  pl.BlockSpec((cout, 1), resident),
                  pl.BlockSpec((cout, 1), resident),
                  pl.BlockSpec((cout, 1), resident),
                  pl.BlockSpec((cout, 1), resident),
                  pl.BlockSpec((cout, 1), resident),
                  pl.BlockSpec((2, tn), tiled)],
        out_specs=pl.BlockSpec((cout, tn), tiled),
        compiler_params=pltpu.CompilerParams(
            dimension_semantics=("parallel",),
            vmem_limit_bytes=_VMEM_LIMIT),
    )(xa, xb, wa, wb, b, sign, isexp, mul, xsel, ysel, xy)


# -------------------------- constants / im2col (JAX) ---------------------------

def make_head_consts(grid_size, anchors, num_classes, input_dim, batch):
    """Compact per-head constants: (C,1) row constants + (2, M) grid offsets."""
    stride = input_dim // grid_size
    A = len(anchors)
    bbox = 5 + num_classes
    C = A * bbox
    gg = grid_size * grid_size
    sign = np.full((C, 1), -1.0, np.float32)     # -1: sigmoid rows, +1: exp rows
    isexp = np.zeros((C, 1), np.float32)
    mul = np.ones((C, 1), np.float32)
    xsel = np.zeros((C, 1), np.float32)
    ysel = np.zeros((C, 1), np.float32)
    for a, (aw, ah) in enumerate(anchors):
        base = a * bbox
        mul[base + 0, 0] = float(stride)
        mul[base + 1, 0] = float(stride)
        mul[base + 2, 0] = float(aw)             # exp(tw) * (aw/stride) * stride = exp(tw)*aw
        mul[base + 3, 0] = float(ah)
        sign[base + 2, 0] = 1.0
        sign[base + 3, 0] = 1.0
        isexp[base + 2, 0] = 1.0
        isexp[base + 3, 0] = 1.0
        xsel[base + 0, 0] = 1.0
        ysel[base + 1, 0] = 1.0
    cell = np.arange(gg)
    x_off = np.tile((cell % grid_size).astype(np.float32), batch) * stride
    y_off = np.tile((cell // grid_size).astype(np.float32), batch) * stride
    xy = np.stack([x_off, y_off], axis=0)        # (2, batch*gg)
    to = jnp.asarray
    return (to(sign), to(isexp), to(mul), to(xsel), to(ysel), to(xy)), A, bbox


def _im2col(x, k, stride, pad):
    """x: (Cin, N, H, W) channel-major -> ((Cin*k*k, N*Hout*Wout), Hout, Wout)."""
    cin, n, h, w = x.shape
    hout = (h + 2 * pad - k) // stride + 1
    wout = (w + 2 * pad - k) // stride + 1
    if k == 1 and pad == 0 and stride == 1:
        return x.reshape(cin, n * h * w), hout, wout
    xp = jnp.pad(x, ((0, 0), (0, 0), (pad, pad), (pad, pad)))
    cols = []
    for kh in range(k):
        for kw in range(k):
            cols.append(xp[:, :, kh:kh + stride * (hout - 1) + 1:stride,
                              kw:kw + stride * (wout - 1) + 1:stride])
    # (Cin, k*k, N, Hout, Wout) -> (Cin*k*k, M)   [Cin-major, kh*k+kw minor]
    patches = jnp.stack(cols, axis=1).reshape(cin * k * k, n * hout * wout)
    return patches, hout, wout


# --------------------------- params + weight packing ---------------------------

def init_params(key):
    """Deterministic synthetic parameters; BN folded into conv weight/bias."""
    params = {}
    in_ch = NET["channels"]
    out_ch_list = []
    for index, cfg in enumerate(CONFIG):
        t = cfg["type"]
        if t == "convolutional":
            cout, k = cfg["filters"], cfg["size"]
            key, k1, k2, k3, k4, k5 = jax.random.split(key, 6)
            w = 0.1 * jax.random.normal(k1, (cout, in_ch, k, k), jnp.float32)
            if cfg["bn"]:
                gamma = 1.0 + 0.1 * jax.random.normal(k2, (cout,), jnp.float32)
                beta = 0.1 * jax.random.normal(k3, (cout,), jnp.float32)
                mean = 0.1 * jax.random.normal(k4, (cout,), jnp.float32)
                var = jnp.abs(jax.random.normal(k5, (cout,), jnp.float32)) + 0.5
                scale = gamma / jnp.sqrt(var + BN_EPS)
                w = w * scale[:, None, None, None]
                b = beta - mean * scale
            else:
                b = 0.1 * jax.random.normal(k2, (cout,), jnp.float32)
            params[index] = (w, b)
            out_ch = cout
        elif t == "shortcut":
            out_ch = out_ch_list[index - 1]
        elif t == "route":
            out_ch = 0
            for layer in cfg["layers"].split(","):
                li = int(layer)
                if li > 0:
                    li -= index
                out_ch += out_ch_list[index + li]
        elif t == "upsample":
            out_ch = out_ch_list[index - 1]
        else:  # yolo
            out_ch = out_ch_list[index - 1]
        out_ch_list.append(out_ch)
        in_ch = out_ch
    return params


def prepare_weights(params):
    """One-time reshape / stack / cast of the conv weights for the fused plan."""
    def flat_w(i):
        w, _ = params[i]
        cout, cin, k, _ = w.shape
        return w.reshape(cout, cin * k * k).astype(jnp.bfloat16)

    def col_b(i):
        return params[i][1].reshape(-1, 1).astype(jnp.float32)

    c7 = CONFIG[7]["filters"]
    w10 = flat_w(10)     # route(-1,-9): Cin 0..c7-1 = upsampled conv7, rest = conv0
    return {
        "w0": flat_w(0), "b0": col_b(0),
        "w1": flat_w(1), "b1": col_b(1),
        "w2": flat_w(2), "b2": col_b(2),
        # conv4 (head) and conv7 both read layer 3's output: one stacked matmul.
        "w47": jnp.concatenate([flat_w(4), flat_w(7)], axis=0),
        "b47": jnp.concatenate([col_b(4), col_b(7)], axis=0),
        "w10a": w10[:, :c7], "w10b": w10[:, c7:], "b10": col_b(10),
    }


# --------------------------------- forward -------------------------------------

def yolo_forward(x_nchw, packed):
    n = x_nchw.shape[0]
    input_dim = NET["height"]
    c0 = CONFIG[0]["filters"]
    c4 = CONFIG[4]["filters"]
    c7 = CONFIG[7]["filters"]

    # One-time layout change to channel-major (C, N, H, W); kept throughout.
    x = jnp.transpose(x_nchw, (1, 0, 2, 3))

    # --- layer 0: 3x3/s1 conv + BN + leaky (kernel A) --------------------------
    p0, h0, w0sz = _im2col(x, CONFIG[0]["size"], CONFIG[0]["stride"], CONFIG[0]["pad"])
    y0 = conv_leaky(p0.astype(jnp.bfloat16), packed["w0"], packed["b0"], c0)   # (8, N*256) bf16

    # --- layers 1-7 fused: conv1 -> conv2 -> shortcut -> {head conv4 + conv7} --
    y0_chw = y0.reshape(c0, n, h0, w0sz)
    p1, g1, _ = _im2col(y0_chw, CONFIG[1]["size"], CONFIG[1]["stride"], CONFIG[1]["pad"])
    ycfg1 = CONFIG[5]
    consts1, a1, bbox1 = make_head_consts(g1, ycfg1["anchors"], ycfg1["classes"],
                                          input_dim, n)
    det1_flat, y7 = mid_block(p1, packed["w1"], packed["b1"], packed["w2"],
                              packed["b2"], packed["w47"], packed["b47"],
                              consts1, head_rows=c4, c7=c7)

    # --- layer 8: nearest 2x upsample (plain JAX) -------------------------------
    y7_chw = y7.reshape(c7, n, g1, g1)
    s = CONFIG[8]["stride"]
    y7_up = jnp.repeat(jnp.repeat(y7_chw, s, axis=2), s, axis=3)
    g2 = s * g1
    xa = y7_up.reshape(c7, n * g2 * g2)                                         # (8, N*256) bf16

    # --- layers 9-11 fused: route(-1,-9) + 1x1 head conv + YOLO (kernel C) -----
    ycfg2 = CONFIG[11]
    consts2, a2, bbox2 = make_head_consts(g2, ycfg2["anchors"], ycfg2["classes"],
                                          input_dim, n)
    det2_flat = route_head(xa, y0, packed["w10a"], packed["w10b"], packed["b10"],
                           consts2)

    # --- detections: (A*bbox, N*G*G) -> (N, G*G*A, bbox), concat heads ---------
    def to_dets(flat, a, bbox, g):
        return (flat.reshape(a, bbox, n, g * g)
                    .transpose(2, 3, 0, 1)
                    .reshape(n, g * g * a, bbox))

    det1 = to_dets(det1_flat, a1, bbox1, g1)
    det2 = to_dets(det2_flat, a2, bbox2, g2)
    return jnp.concatenate([det1, det2], axis=1)


if __name__ == "__main__":
    key = jax.random.PRNGKey(0)
    pkey, xkey = jax.random.split(key)
    params = init_params(pkey)
    packed = prepare_weights(params)
    x = jax.random.normal(xkey, (2, NET["channels"], NET["height"], NET["width"]),
                          jnp.float32)
    fwd = jax.jit(yolo_forward)
    detections = fwd(x, packed)
    jax.block_until_ready(detections)
    # two YOLO heads: 8*8*2 + 16*16*2 = 640 boxes, 5 + 3 classes = 8 attrs
    assert detections.shape == (2, 640, 8), detections.shape
    assert bool(jnp.all(jnp.isfinite(detections))), "non-finite detections"
    print("KERNEL_OK")
</pallas_src>

<mosaic_0001>
module attributes {stable_mosaic.version = 11 : i64} {
  func.func @_conv_leaky_kernel(%arg0: i32, %arg1: memref<36x256xbf16, #tpu.memory_space<vmem>>, %arg2: memref<8x36xbf16, #tpu.memory_space<vmem>>, %arg3: memref<8x1xf32, #tpu.memory_space<vmem>>, %arg4: memref<8x256xbf16, #tpu.memory_space<vmem>>) attributes {dimension_semantics = [#tpu.dimension_semantics<parallel>], iteration_bounds = array<i64: 2>, scalar_prefetch = 0 : i64, scratch_operands = 0 : i64, tpu.core_type = #tpu.core_type<tc>, window_params = [{transform_indices = @transform_0, window_bounds = array<i64: 36, 256>}, {pipeline_mode = #tpu.pipeline_mode<synchronous>, transform_indices = @transform_1, window_bounds = array<i64: 8, 36>}, {pipeline_mode = #tpu.pipeline_mode<synchronous>, transform_indices = @transform_2, window_bounds = array<i64: 8, 1>}, {transform_indices = @transform_3, window_bounds = array<i64: 8, 256>}]} {
    %c0 = arith.constant 0 : index
    %c0_0 = arith.constant 0 : index
    %0 = vector.load %arg2[%c0, %c0_0] : memref<8x36xbf16, #tpu.memory_space<vmem>>, vector<8x36xbf16>
    %c0_1 = arith.constant 0 : index
    %c0_2 = arith.constant 0 : index
    %1 = vector.load %arg1[%c0_1, %c0_2] : memref<36x256xbf16, #tpu.memory_space<vmem>>, vector<36x256xbf16>
    %cst = arith.constant dense<0.000000e+00> : vector<8x256xf32>
    %2 = tpu.matmul %0, %1, %cst {dimension_numbers = #tpu.dot_dimension_numbers<[1], [0], [0], [1], [0, 0, 1, 1], [], []>} : vector<8x36xbf16>, vector<36x256xbf16>, vector<8x256xf32> -> vector<8x256xf32>
    %c0_3 = arith.constant 0 : index
    %c0_4 = arith.constant 0 : index
    %3 = vector.load %arg3[%c0_3, %c0_4] : memref<8x1xf32, #tpu.memory_space<vmem>>, vector<8x1xf32>
    %4 = vector.broadcast %3 : vector<8x1xf32> to vector<8x256xf32>
    %5 = arith.addf %2, %4 : vector<8x256xf32>
    %cst_5 = arith.constant 1.000000e-01 : f32
    %6 = vector.broadcast %cst_5 : f32 to vector<8x256xf32>
    %7 = arith.mulf %6, %5 : vector<8x256xf32>
    %8 = arith.maximumf %5, %7 : vector<8x256xf32>
    %9 = arith.truncf %8 : vector<8x256xf32> to vector<8x256xbf16>
    %c0_6 = arith.constant 0 : index
    %c0_7 = arith.constant 0 : index
    %10 = vector.load %arg4[%c0_6, %c0_7] : memref<8x256xbf16, #tpu.memory_space<vmem>>, vector<8x256xbf16>
    tpu.vector_store %arg4[%c0_6, %c0_7], %9 {strides = array<i32>} : memref<8x256xbf16, #tpu.memory_space<vmem>>, vector<8x256xbf16>,
    return
  }
  func.func @transform_0(%arg0: i32) -> (i32, i32) {
    %c0_i32 = arith.constant 0 : i32
    %c0_i32_0 = arith.constant 0 : i32
    return %c0_i32, %arg0 : i32, i32
  }
  func.func @transform_1(%arg0: i32) -> (i32, i32) {
    %c0_i32 = arith.constant 0 : i32
    %c0_i32_0 = arith.constant 0 : i32
    %c0_i32_1 = arith.constant 0 : i32
    return %c0_i32, %c0_i32_0 : i32, i32
  }
  func.func @transform_2(%arg0: i32) -> (i32, i32) {
    %c0_i32 = arith.constant 0 : i32
    %c0_i32_0 = arith.constant 0 : i32
    %c0_i32_1 = arith.constant 0 : i32
    return %c0_i32, %c0_i32_0 : i32, i32
  }
  func.func @transform_3(%arg0: i32) -> (i32, i32) {
    %c0_i32 = arith.constant 0 : i32
    %c0_i32_0 = arith.constant 0 : i32
    return %c0_i32, %arg0 : i32, i32
  }
}

module attributes {stable_mosaic.version = 11 : i64} {
  func.func @_mid_block_kernel(%arg0: memref<72x128xbf16, #tpu.memory_space<vmem>>, %arg1: memref<16x72xbf16, #tpu.memory_space<vmem>>, %arg2: memref<16x1xf32, #tpu.memory_space<vmem>>, %arg3: memref<16x16xbf16, #tpu.memory_space<vmem>>, %arg4: memref<16x1xf32, #tpu.memory_space<vmem>>, %arg5: memref<24x16xbf16, #tpu.memory_space<vmem>>, %arg6: memref<24x1xf32, #tpu.memory_space<vmem>>, %arg7: memref<16x1xf32, #tpu.memory_space<vmem>>, %arg8: memref<16x1xf32, #tpu.memory_space<vmem>>, %arg9: memref<16x1xf32, #tpu.memory_space<vmem>>, %arg10: memref<16x1xf32, #tpu.memory_space<vmem>>, %arg11: memref<16x1xf32, #tpu.memory_space<vmem>>, %arg12: memref<2x128xf32, #tpu.memory_space<vmem>>, %arg13: memref<16x128xf32, #tpu.memory_space<vmem>>, %arg14: memref<8x128xbf16, #tpu.memory_space<vmem>>) attributes {dimension_semantics = [], scalar_prefetch = 0 : i64, scratch_operands = 0 : i64, tpu.core_type = #tpu.core_type<tc>} {
    %c0 = arith.constant 0 : index
    %c0_0 = arith.constant 0 : index
    %0 = vector.load %arg1[%c0, %c0_0] : memref<16x72xbf16, #tpu.memory_space<vmem>>, vector<16x72xbf16>
    %c0_1 = arith.constant 0 : index
    %c0_2 = arith.constant 0 : index
    %1 = vector.load %arg0[%c0_1, %c0_2] : memref<72x128xbf16, #tpu.memory_space<vmem>>, vector<72x128xbf16>
    %cst = arith.constant dense<0.000000e+00> : vector<16x128xf32>
    %2 = tpu.matmul %0, %1, %cst {dimension_numbers = #tpu.dot_dimension_numbers<[1], [0], [0], [1], [0, 0, 1, 1], [], []>} : vector<16x72xbf16>, vector<72x128xbf16>, vector<16x128xf32> -> vector<16x128xf32>
    %c0_3 = arith.constant 0 : index
    %c0_4 = arith.constant 0 : index
    %3 = vector.load %arg2[%c0_3, %c0_4] : memref<16x1xf32, #tpu.memory_space<vmem>>, vector<16x1xf32>
    %4 = vector.broadcast %3 : vector<16x1xf32> to vector<16x128xf32>
    %5 = arith.addf %2, %4 : vector<16x128xf32>
    %cst_5 = arith.constant 1.000000e-01 : f32
    %6 = vector.broadcast %cst_5 : f32 to vector<16x128xf32>
    %7 = arith.mulf %6, %5 : vector<16x128xf32>
    %8 = arith.maximumf %5, %7 : vector<16x128xf32>
    %c0_6 = arith.constant 0 : index
    %c0_7 = arith.constant 0 : index
    %9 = vector.load %arg3[%c0_6, %c0_7] : memref<16x16xbf16, #tpu.memory_space<vmem>>, vector<16x16xbf16>
    %10 = arith.truncf %8 : vector<16x128xf32> to vector<16x128xbf16>
    %cst_8 = arith.constant dense<0.000000e+00> : vector<16x128xf32>
    %11 = tpu.matmul %9, %10, %cst_8 {dimension_numbers = #tpu.dot_dimension_numbers<[1], [0], [0], [1], [0, 0, 1, 1], [], []>} : vector<16x16xbf16>, vector<16x128xbf16>, vector<16x128xf32> -> vector<16x128xf32>
    %c0_9 = arith.constant 0 : index
    %c0_10 = arith.constant 0 : index
    %12 = vector.load %arg4[%c0_9, %c0_10] : memref<16x1xf32, #tpu.memory_space<vmem>>, vector<16x1xf32>
    %13 = vector.broadcast %12 : vector<16x1xf32> to vector<16x128xf32>
    %14 = arith.addf %11, %13 : vector<16x128xf32>
    %cst_11 = arith.constant 1.000000e-01 : f32
    %15 = vector.broadcast %cst_11 : f32 to vector<16x128xf32>
    %16 = arith.mulf %15, %14 : vector<16x128xf32>
    %17 = arith.maximumf %14, %16 : vector<16x128xf32>
    %18 = arith.addf %17, %8 : vector<16x128xf32>
    %19 = arith.truncf %18 : vector<16x128xf32> to vector<16x128xbf16>
    %c0_12 = arith.constant 0 : index
    %c0_13 = arith.constant 0 : index
    %20 = vector.load %arg5[%c0_12, %c0_13] : memref<24x16xbf16, #tpu.memory_space<vmem>>, vector<24x16xbf16>
    %cst_14 = arith.constant dense<0.000000e+00> : vector<24x128xf32>
    %21 = tpu.matmul %20, %19, %cst_14 {dimension_numbers = #tpu.dot_dimension_numbers<[1], [0], [0], [1], [0, 0, 1, 1], [], []>} : vector<24x16xbf16>, vector<16x128xbf16>, vector<24x128xf32> -> vector<24x128xf32>
    %c0_15 = arith.constant 0 : index
    %c0_16 = arith.constant 0 : index
    %22 = vector.load %arg6[%c0_15, %c0_16] : memref<24x1xf32, #tpu.memory_space<vmem>>, vector<24x1xf32>
    %23 = vector.broadcast %22 : vector<24x1xf32> to vector<24x128xf32>
    %24 = arith.addf %21, %23 : vector<24x128xf32>
    %25 = vector.extract_strided_slice %24 {offsets = [0, 0], sizes = [16, 128], strides = [1, 1]} : vector<24x128xf32> to vector<16x128xf32>
    %c0_17 = arith.constant 0 : index
    %c0_18 = arith.constant 0 : index
    %26 = vector.load %arg7[%c0_17, %c0_18] : memref<16x1xf32, #tpu.memory_space<vmem>>, vector<16x1xf32>
    %c0_19 = arith.constant 0 : index
    %c0_20 = arith.constant 0 : index
    %27 = vector.load %arg8[%c0_19, %c0_20] : memref<16x1xf32, #tpu.memory_space<vmem>>, vector<16x1xf32>
    %c0_21 = arith.constant 0 : index
    %c0_22 = arith.constant 0 : index
    %28 = vector.load %arg9[%c0_21, %c0_22] : memref<16x1xf32, #tpu.memory_space<vmem>>, vector<16x1xf32>
    %c0_23 = arith.constant 0 : index
    %c0_24 = arith.constant 0 : index
    %29 = vector.load %arg10[%c0_23, %c0_24] : memref<16x1xf32, #tpu.memory_space<vmem>>, vector<16x1xf32>
    %c0_25 = arith.constant 0 : index
    %c0_26 = arith.constant 0 : index
    %30 = vector.load %arg11[%c0_25, %c0_26] : memref<16x1xf32, #tpu.memory_space<vmem>>, vector<16x1xf32>
    %c0_27 = arith.constant 0 : index
    %c0_28 = arith.constant 0 : index
    %31 = vector.load %arg12[%c0_27, %c0_28] : memref<2x128xf32, #tpu.memory_space<vmem>>, vector<2x128xf32>
    %32 = vector.broadcast %26 : vector<16x1xf32> to vector<16x128xf32>
    %33 = arith.mulf %25, %32 : vector<16x128xf32>
    %34 = math.exp %33 : vector<16x128xf32>
    %cst_29 = arith.constant 1.000000e+00 : f32
    %35 = vector.broadcast %cst_29 : f32 to vector<16x128xf32>
    %36 = arith.addf %35, %34 : vector<16x128xf32>
    %37 = tpu.reciprocal %36 {approx = true} : vector<16x128xf32> -> vector<16x128xf32>
    %38 = vector.shape_cast %27 : vector<16x1xf32> to vector<16x1xf32>
    %39 = vector.broadcast %38 : vector<16x1xf32> to vector<16x128xf32>
    %cst_30 = arith.constant 5.000000e-01 : f32
    %40 = vector.broadcast %cst_30 : f32 to vector<16x128xf32>
    %41 = arith.cmpf ogt, %39, %40 : vector<16x128xf32>
    %42 = arith.select %41, %34, %37 : vector<16x128xi1>, vector<16x128xf32>
    %43 = vector.extract_strided_slice %31 {offsets = [0, 0], sizes = [1, 128], strides = [1, 1]} : vector<2x128xf32> to vector<1x128xf32>
    %44 = vector.broadcast %43 : vector<1x128xf32> to vector<16x128xf32>
    %45 = vector.broadcast %29 : vector<16x1xf32> to vector<16x128xf32>
    %46 = arith.mulf %44, %45 : vector<16x128xf32>
    %47 = vector.extract_strided_slice %31 {offsets = [1, 0], sizes = [1, 128], strides = [1, 1]} : vector<2x128xf32> to vector<1x128xf32>
    %48 = vector.broadcast %47 : vector<1x128xf32> to vector<16x128xf32>
    %49 = vector.broadcast %30 : vector<16x1xf32> to vector<16x128xf32>
    %50 = arith.mulf %48, %49 : vector<16x128xf32>
    %51 = arith.addf %46, %50 : vector<16x128xf32>
    %52 = vector.broadcast %28 : vector<16x1xf32> to vector<16x128xf32>
    %53 = arith.mulf %42, %52 : vector<16x128xf32>
    %54 = arith.addf %53, %51 : vector<16x128xf32>
    %c0_31 = arith.constant 0 : index
    %c0_32 = arith.constant 0 : index
    %55 = vector.load %arg13[%c0_31, %c0_32] : memref<16x128xf32, #tpu.memory_space<vmem>>, vector<16x128xf32>
    tpu.vector_store %arg13[%c0_31, %c0_32], %54 {strides = array<i32>} : memref<16x128xf32, #tpu.memory_space<vmem>>, vector<16x128xf32>,
    %56 = vector.extract_strided_slice %24 {offsets = [16, 0], sizes = [8, 128], strides = [1, 1]} : vector<24x128xf32> to vector<8x128xf32>
    %cst_33 = arith.constant 1.000000e-01 : f32
    %57 = vector.broadcast %cst_33 : f32 to vector<8x128xf32>
    %58 = arith.mulf %57, %56 : vector<8x128xf32>
    %59 = arith.maximumf %56, %58 : vector<8x128xf32>
    %60 = arith.truncf %59 : vector<8x128xf32> to vector<8x128xbf16>
    %c0_34 = arith.constant 0 : index
    %c0_35 = arith.constant 0 : index
    %61 = vector.load %arg14[%c0_34, %c0_35] : memref<8x128xbf16, #tpu.memory_space<vmem>>, vector<8x128xbf16>
    tpu.vector_store %arg14[%c0_34, %c0_35], %60 {strides = array<i32>} : memref<8x128xbf16, #tpu.memory_space<vmem>>, vector<8x128xbf16>,
    return
  }
}

module attributes {stable_mosaic.version = 11 : i64} {
  func.func @_route_head_kernel(%arg0: i32, %arg1: memref<8x256xbf16, #tpu.memory_space<vmem>>, %arg2: memref<8x256xbf16, #tpu.memory_space<vmem>>, %arg3: memref<16x8xbf16, #tpu.memory_space<vmem>>, %arg4: memref<16x8xbf16, #tpu.memory_space<vmem>>, %arg5: memref<16x1xf32, #tpu.memory_space<vmem>>, %arg6: memref<16x1xf32, #tpu.memory_space<vmem>>, %arg7: memref<16x1xf32, #tpu.memory_space<vmem>>, %arg8: memref<16x1xf32, #tpu.memory_space<vmem>>, %arg9: memref<16x1xf32, #tpu.memory_space<vmem>>, %arg10: memref<16x1xf32, #tpu.memory_space<vmem>>, %arg11: memref<2x256xf32, #tpu.memory_space<vmem>>, %arg12: memref<16x256xf32, #tpu.memory_space<vmem>>) attributes {dimension_semantics = [#tpu.dimension_semantics<parallel>], iteration_bounds = array<i64: 2>, scalar_prefetch = 0 : i64, scratch_operands = 0 : i64, tpu.core_type = #tpu.core_type<tc>, window_params = [{transform_indices = @transform_0, window_bounds = array<i64: 8, 256>}, {transform_indices = @transform_1, window_bounds = array<i64: 8, 256>}, {pipeline_mode = #tpu.pipeline_mode<synchronous>, transform_indices = @transform_2, window_bounds = array<i64: 16, 8>}, {pipeline_mode = #tpu.pipeline_mode<synchronous>, transform_indices = @transform_3, window_bounds = array<i64: 16, 8>}, {pipeline_mode = #tpu.pipeline_mode<synchronous>, transform_indices = @transform_4, window_bounds = array<i64: 16, 1>}, {pipeline_mode = #tpu.pipeline_mode<synchronous>, transform_indices = @transform_5, window_bounds = array<i64: 16, 1>}, {pipeline_mode = #tpu.pipeline_mode<synchronous>, transform_indices = @transform_6, window_bounds = array<i64: 16, 1>}, {pipeline_mode = #tpu.pipeline_mode<synchronous>, transform_indices = @transform_7, window_bounds = array<i64: 16, 1>}, {pipeline_mode = #tpu.pipeline_mode<synchronous>, transform_indices = @transform_8, window_bounds = array<i64: 16, 1>}, {pipeline_mode = #tpu.pipeline_mode<synchronous>, transform_indices = @transform_9, window_bounds = array<i64: 16, 1>}, {transform_indices = @transform_10, window_bounds = array<i64: 2, 256>}, {transform_indices = @transform_11, window_bounds = array<i64: 16, 256>}]} {
    %c0 = arith.constant 0 : index
    %c0_0 = arith.constant 0 : index
    %0 = vector.load %arg3[%c0, %c0_0] : memref<16x8xbf16, #tpu.memory_space<vmem>>, vector<16x8xbf16>
    %c0_1 = arith.constant 0 : index
    %c0_2 = arith.constant 0 : index
    %1 = vector.load %arg1[%c0_1, %c0_2] : memref<8x256xbf16, #tpu.memory_space<vmem>>, vector<8x256xbf16>
    %cst = arith.constant dense<0.000000e+00> : vector<16x256xf32>
    %2 = tpu.matmul %0, %1, %cst {dimension_numbers = #tpu.dot_dimension_numbers<[1], [0], [0], [1], [0, 0, 1, 1], [], []>} : vector<16x8xbf16>, vector<8x256xbf16>, vector<16x256xf32> -> vector<16x256xf32>
    %c0_3 = arith.constant 0 : index
    %c0_4 = arith.constant 0 : index
    %3 = vector.load %arg4[%c0_3, %c0_4] : memref<16x8xbf16, #tpu.memory_space<vmem>>, vector<16x8xbf16>
    %c0_5 = arith.constant 0 : index
    %c0_6 = arith.constant 0 : index
    %4 = vector.load %arg2[%c0_5, %c0_6] : memref<8x256xbf16, #tpu.memory_space<vmem>>, vector<8x256xbf16>
    %cst_7 = arith.constant dense<0.000000e+00> : vector<16x256xf32>
    %5 = tpu.matmul %3, %4, %cst_7 {dimension_numbers = #tpu.dot_dimension_numbers<[1], [0], [0], [1], [0, 0, 1, 1], [], []>} : vector<16x8xbf16>, vector<8x256xbf16>, vector<16x256xf32> -> vector<16x256xf32>
    %6 = arith.addf %2, %5 : vector<16x256xf32>
    %c0_8 = arith.constant 0 : index
    %c0_9 = arith.constant 0 : index
    %7 = vector.load %arg5[%c0_8, %c0_9] : memref<16x1xf32, #tpu.memory_space<vmem>>, vector<16x1xf32>
    %8 = vector.broadcast %7 : vector<16x1xf32> to vector<16x256xf32>
    %9 = arith.addf %6, %8 : vector<16x256xf32>
    %c0_10 = arith.constant 0 : index
    %c0_11 = arith.constant 0 : index
    %10 = vector.load %arg6[%c0_10, %c0_11] : memref<16x1xf32, #tpu.memory_space<vmem>>, vector<16x1xf32>
    %c0_12 = arith.constant 0 : index
    %c0_13 = arith.constant 0 : index
    %11 = vector.load %arg7[%c0_12, %c0_13] : memref<16x1xf32, #tpu.memory_space<vmem>>, vector<16x1xf32>
    %c0_14 = arith.constant 0 : index
    %c0_15 = arith.constant 0 : index
    %12 = vector.load %arg8[%c0_14, %c0_15] : memref<16x1xf32, #tpu.memory_space<vmem>>, vector<16x1xf32>
    %c0_16 = arith.constant 0 : index
    %c0_17 = arith.constant 0 : index
    %13 = vector.load %arg9[%c0_16, %c0_17] : memref<16x1xf32, #tpu.memory_space<vmem>>, vector<16x1xf32>
    %c0_18 = arith.constant 0 : index
    %c0_19 = arith.constant 0 : index
    %14 = vector.load %arg10[%c0_18, %c0_19] : memref<16x1xf32, #tpu.memory_space<vmem>>, vector<16x1xf32>
    %c0_20 = arith.constant 0 : index
    %c0_21 = arith.constant 0 : index
    %15 = vector.load %arg11[%c0_20, %c0_21] : memref<2x256xf32, #tpu.memory_space<vmem>>, vector<2x256xf32>
    %16 = vector.broadcast %10 : vector<16x1xf32> to vector<16x256xf32>
    %17 = arith.mulf %9, %16 : vector<16x256xf32>
    %18 = math.exp %17 : vector<16x256xf32>
    %cst_22 = arith.constant 1.000000e+00 : f32
    %19 = vector.broadcast %cst_22 : f32 to vector<16x256xf32>
    %20 = arith.addf %19, %18 : vector<16x256xf32>
    %21 = tpu.reciprocal %20 {approx = true} : vector<16x256xf32> -> vector<16x256xf32>
    %22 = vector.shape_cast %11 : vector<16x1xf32> to vector<16x1xf32>
    %23 = vector.broadcast %22 : vector<16x1xf32> to vector<16x256xf32>
    %cst_23 = arith.constant 5.000000e-01 : f32
    %24 = vector.broadcast %cst_23 : f32 to vector<16x256xf32>
    %25 = arith.cmpf ogt, %23, %24 : vector<16x256xf32>
    %26 = arith.select %25, %18, %21 : vector<16x256xi1>, vector<16x256xf32>
    %27 = vector.extract_strided_slice %15 {offsets = [0, 0], sizes = [1, 256], strides = [1, 1]} : vector<2x256xf32> to vector<1x256xf32>
    %28 = vector.broadcast %27 : vector<1x256xf32> to vector<16x256xf32>
    %29 = vector.broadcast %13 : vector<16x1xf32> to vector<16x256xf32>
    %30 = arith.mulf %28, %29 : vector<16x256xf32>
    %31 = vector.extract_strided_slice %15 {offsets = [1, 0], sizes = [1, 256], strides = [1, 1]} : vector<2x256xf32> to vector<1x256xf32>
    %32 = vector.broadcast %31 : vector<1x256xf32> to vector<16x256xf32>
    %33 = vector.broadcast %14 : vector<16x1xf32> to vector<16x256xf32>
    %34 = arith.mulf %32, %33 : vector<16x256xf32>
    %35 = arith.addf %30, %34 : vector<16x256xf32>
    %36 = vector.broadcast %12 : vector<16x1xf32> to vector<16x256xf32>
    %37 = arith.mulf %26, %36 : vector<16x256xf32>
    %38 = arith.addf %37, %35 : vector<16x256xf32>
    %c0_24 = arith.constant 0 : index
    %c0_25 = arith.constant 0 : index
    %39 = vector.load %arg12[%c0_24, %c0_25] : memref<16x256xf32, #tpu.memory_space<vmem>>, vector<16x256xf32>
    tpu.vector_store %arg12[%c0_24, %c0_25], %38 {strides = array<i32>} : memref<16x256xf32, #tpu.memory_space<vmem>>, vector<16x256xf32>,
    return
  }
  func.func @transform_0(%arg0: i32) -> (i32, i32) {
    %c0_i32 = arith.constant 0 : i32
    %c0_i32_0 = arith.constant 0 : i32
    return %c0_i32, %arg0 : i32, i32
  }
  func.func @transform_1(%arg0: i32) -> (i32, i32) {
    %c0_i32 = arith.constant 0 : i32
    %c0_i32_0 = arith.constant 0 : i32
    return %c0_i32, %arg0 : i32, i32
  }
  func.func @transform_2(%arg0: i32) -> (i32, i32) {
    %c0_i32 = arith.constant 0 : i32
    %c0_i32_0 = arith.constant 0 : i32
    %c0_i32_1 = arith.constant 0 : i32
    return %c0_i32, %c0_i32_0 : i32, i32
  }
  func.func @transform_3(%arg0: i32) -> (i32, i32) {
    %c0_i32 = arith.constant 0 : i32
    %c0_i32_0 = arith.constant 0 : i32
    %c0_i32_1 = arith.constant 0 : i32
    return %c0_i32, %c0_i32_0 : i32, i32
  }
  func.func @transform_4(%arg0: i32) -> (i32, i32) {
    %c0_i32 = arith.constant 0 : i32
    %c0_i32_0 = arith.constant 0 : i32
    %c0_i32_1 = arith.constant 0 : i32
    return %c0_i32, %c0_i32_0 : i32, i32
  }
  func.func @transform_5(%arg0: i32) -> (i32, i32) {
    %c0_i32 = arith.constant 0 : i32
    %c0_i32_0 = arith.constant 0 : i32
    %c0_i32_1 = arith.constant 0 : i32
    return %c0_i32, %c0_i32_0 : i32, i32
  }
  func.func @transform_6(%arg0: i32) -> (i32, i32) {
    %c0_i32 = arith.constant 0 : i32
    %c0_i32_0 = arith.constant 0 : i32
    %c0_i32_1 = arith.constant 0 : i32
    return %c0_i32, %c0_i32_0 : i32, i32
  }
  func.func @transform_7(%arg0: i32) -> (i32, i32) {
    %c0_i32 = arith.constant 0 : i32
    %c0_i32_0 = arith.constant 0 : i32
    %c0_i32_1 = arith.constant 0 : i32
    return %c0_i32, %c0_i32_0 : i32, i32
  }
  func.func @transform_8(%arg0: i32) -> (i32, i32) {
    %c0_i32 = arith.constant 0 : i32
    %c0_i32_0 = arith.constant 0 : i32
    %c0_i32_1 = arith.constant 0 : i32
    return %c0_i32, %c0_i32_0 : i32, i32
  }
  func.func @transform_9(%arg0: i32) -> (i32, i32) {
    %c0_i32 = arith.constant 0 : i32
    %c0_i32_0 = arith.constant 0 : i32
    %c0_i32_1 = arith.constant 0 : i32
    return %c0_i32, %c0_i32_0 : i32, i32
  }
  func.func @transform_10(%arg0: i32) -> (i32, i32) {
    %c0_i32 = arith.constant 0 : i32
    %c0_i32_0 = arith.constant 0 : i32
    return %c0_i32, %arg0 : i32, i32
  }
  func.func @transform_11(%arg0: i32) -> (i32, i32) {
    %c0_i32 = arith.constant 0 : i32
    %c0_i32_0 = arith.constant 0 : i32
    return %c0_i32, %arg0 : i32, i32
  }
}

</mosaic_0001>

<bundles_post_ra>
// kernel: yolo_forward.3
= control target key start
LH: loop header
LB: loop body
LE: loop exit
PB: predicated region body
PF: predicated region fallthrough
CT: control target
= control target key end

     0   :  { %s475_s12 = smov 0   ;;  %s477_s13 = smov 0   ;;  %s533_s0 = inlined_call_operand.vmem [shape: bf16[36,512], index: 0, kind: input, shape index: {}]   ;;  %s534_s1 = inlined_call_operand.vmem [shape: bf16[8,36], index: 1, kind: input, shape index: {}]   ;;  %s535_s2 = inlined_call_operand.vmem [shape: f32[8,1], index: 2, kind: input, shape index: {}]   ;;  %s536_s3 = inlined_call_operand.vmem [shape: bf16[8,512], index: 3, kind: output, shape index: {}]  }
   0x1   :  { %s479_s14 = smov 0  }
   0x2 LB: > { %s368_s15 = sadd.s32 4294967295, %s452_s14   ;;  %s492_s16 = sadd.s32 1, %s452_s14   ;;  %s452_s14 = sphi %s479_s14, %s539_s14   ;;  %s448_s13 = sphi %s477_s13, %s538_s13   ;;  %s444_s12 = sphi %s475_s12, %s537_s12  }
   0x3   : > { %s17_s17 = ssub.s32 %s452_s14, %s492_s16  ;;  %s20_s18 = sadd.s32 1, %s448_s13 }
   0x4   : > { %p18_p0 = scmp.eq.s32.totalorder %s17_s17, 0  ;;  %p27_p1 = scmp.ne.s32.totalorder %s448_s13, %s444_s12 }
   0x5   : > { %p28_p2 = scmp.eq.s32.totalorder %s452_s14, 0  ;;  %p371_p4 = scmp.ge.s32.totalorder %s452_s14, 2 }
   0x6   : > { %s501_s19 = scalar_select %p18_p0, %s448_s13, %s20_s18  }
   0x7   : > { %p29_p3 = por %p28_p2, %p27_p1  ;;  %127 = sbr.rel (%p371_p4) target bundleno = 21 (0x15), region = 24 }
   0xc   : > { %130 = sbr.rel (!%p29_p3) target bundleno = 21 (0x15), region = 28  ;;  %s132_s20 = sand.u32 (%p29_p3), 1, %s448_s13  }
   0xd   : > { %s397_s21 = sshll.u32 (%p29_p3), %s452_s14, 3  ;;  %s402_s22 = smul.u32 (%p29_p3), 40, %s132_s20 }
   0xe   : > { %s137_s25 = scalar_lea.vmem (%p29_p3), %s533_s0, %s397_s21 }
   0xf   : > { %v174_v0 = vld [vmem:[%s137_s25] sm:$0xff] (%p29_p3)  ;;  %v176_v1 = vld [vmem:[%s137_s25 + $0x10] sm:$0xff] (%p29_p3)  ;;  %s134_s26 = scalar_lea.vmem (%p29_p3), [#allocation2], %s402_s22 }
  0x10   : > { %v178_v2 = vld [vmem:[%s137_s25 + $0x20] sm:$0xff] (%p29_p3)  ;;  %175 = vst [vmem:[%s134_s26] sm:$0xff] (%p29_p3), %v174_v0  ;;  %v180_v3 = vld [vmem:[%s137_s25 + $0x30] sm:$0xff] (%p29_p3) }
  0x11   : > { %177 = vst [vmem:[%s134_s26 + $0x8] sm:$0xff] %v176_v1  ;;  %v182_v4 = vld [vmem:[%s137_s25 + $0x40] sm:$0xff] }
  0x12   : > { %179 = vst [vmem:[%s134_s26 + $0x10] sm:$0xff] %v178_v2 }
  0x13   : > { %181 = vst [vmem:[%s134_s26 + $0x18] sm:$0xff] %v180_v3 }
  0x14   : > { %183 = vst [vmem:[%s134_s26 + $0x20] sm:$0xff] %v182_v4 }
  0x15 PF: > { %p374_p5 = scmp.ge.s32.totalorder %s452_s14, 1  ;;  %p188_p6 = scmp.lt.s32.totalorder %s452_s14, 3 }
  0x17   : > { %p189_p7 = pnand %p374_p5, %p188_p6 }
  0x18   : > { %s195_s27 = sand.u32 (!%p189_p7), 1, %s444_s12   ;;  %s375_s7 = sshll.u32 (!%p189_p7), %s368_s15, 1 }
  0x19   : > { %192 = sbr.rel (%p189_p7) target bundleno = 183 (0xb7), region = 66  ;;  %p220_p8 = scmp.lt.s32.totalorder (!%p189_p7), %s375_s7, 3 }
  0x1a   : > { %s403_s28 = smul.u32 (!%p189_p7), 40, %s195_s27 }
  0x1c   : > { %s197_s4 = scalar_lea.vmem (!%p189_p7), [#allocation2], %s403_s28 }
  0x1e   : > { %v454_v5 = vmov 0   ;;  %v232_v6 = vld [vmem:[%s535_s2] sm:$0xff]  ;;  %vm267_vm0 = vcmask 1041408   ;;  %v387_v10 = vld [vmem:[%s197_s4 + $0x10] sm:$0xf]  ;;  %vm263_vm1 = vcmask 293888  }
  0x1f   : > { %429 = vset.pattern.permute.xlu0 %v454_v5  ;;  %v231_v7 = vld [vmem:[%s197_s4 + $0x20] sm:$0x33]  ;;  %v401_v13 = vld [vmem:[%s197_s4 + $0x14] sm:$0xf0]  ;;  %v400_v14 = vld [vmem:[%s197_s4 + $0x14] sm:$0xf] }
  0x20   : > { %235 = vperm.xlu0 %429, %v232_v6   ;;  %v251_v8 = vunpack.c.l.b16 %v231_v7  ;;  %v252_v9 = vunpack.c.h.b16 %v231_v7  ;;  %v389_v15 = vld [vmem:[%s197_s4 + $0x18] sm:$0xf0]  ;;  %v388_v18 = vor.u32 %v401_v13, %v387_v10  ;;  %v379_v20 = vld [vmem:[%s197_s4] sm:$0xf]  ;;  %v399_v21 = vld [vmem:[%s197_s4 + $0x4] sm:$0xf0] }
  0x21   : > { %v392_v19 = vor.u32 %v400_v14, %v389_v15  ;;  %v398_v22 = vld [vmem:[%s197_s4 + $0x4] sm:$0xf]  ;;  %v381_v23 = vld [vmem:[%s197_s4 + $0x8] sm:$0xf0]  ;;  %v380_v24 = vor.u32 %v399_v21, %v379_v20  ;;  %v226_v26 = vld [vmem:[%s534_s1] sm:$0xf] }
  0x22   : > { %v257_v11 = vpack.c.b16 %v251_v8, %v251_v8  ;;  %v258_v12 = vpack.c.b16 %v252_v9, %v252_v9  ;;  %v384_v25 = vor.u32 %v398_v22, %v381_v23  ;;  %s541_s7 = smov (!%p220_p8, %s375_s7), 3 }
  0x23   : > { %s376_s8 = sshll.u32 %s541_s7, 2 }
  0x24   : > { %v269_v16 = vsel %vm267_vm0, %v257_v11, 0  ;;  %v272_v17 = vsel %vm267_vm0, %v258_v12, 0  ;;  %s223_s11 = scalar_lea.vmem %s536_s3, %s376_s8 }
  0x25   : > { %279 = vmatpush.bf16.msra.mxu0 %v269_v16  ;;  %292 = vmatpush.bf16.msra.mxu1 %v272_v17 }
  0x29   : > { %280 = vmatpush.bf16.msra.mxu0 %v388_v18  ;;  %293 = vmatpush.bf16.msra.mxu1 %v392_v19 }
  0x2d   : > { %281 = vmatpush.bf16.msra.mxu0 %v380_v24  ;;  %294 = vmatpush.bf16.msra.mxu1 %v384_v25 }
  0x30   : > { %393 = vmatmul.msk.bf16.vlgmr.msra.gmra.mxu0 %vm263_vm1, %v226_v26  ;;  %394 = vmatmul.msk.bf16.vlgmr.msra.gmra.mxu1 %vm263_vm1, %v226_v26 }
  0x92   : > { %v236_v27 = vpop.permute.xlu0 %235 }
  0xad   : > { %v283_v28 = vpop.f32.mrf.mxu0  ;;  %v296_v29 = vpop.f32.mrf.mxu1 }
  0xae   : > { %v284_v30 = vadd.f32 %v283_v28, %v236_v27  ;;  %v297_v31 = vadd.f32 %v296_v29, %v236_v27 }
  0xb0   : > { %v300_v32 = vmul.f32 0.1, %v284_v30  ;;  %v301_v33 = vmul.f32 0.1, %v297_v31 }
  0xb2   : > { %v302_v34 = vmax.f32 %v284_v30, %v300_v32  ;;  %v303_v35 = vmax.f32 %v297_v31, %v301_v33 }
  0xb4   : > { %v304_v36 = vpack.c.bf16 %v303_v35, %v302_v34 }
  0xb5   : > { %v285_v37 = vpop.f32.mrf.mxu0  ;;  %v298_v38 = vpop.f32.mrf.mxu1 }
  0xb6   : > { %305 = vst [vmem:[%s223_s11] sm:$0xff] %v304_v36 }
  0xb7 PF: > { %p10_p9 = scmp.ge.s32.totalorder %s492_s16, 4   ;;  %s537_s12 = smov %s448_s13 }
  0xb8   : > { %s538_s13 = smov %s501_s19  ;;  %s539_s14 = smov %s492_s16 }
  0xb9   :  { %12 = sbr.rel (!%p10_p9) target bundleno = 2 (0x2), region = 105 }

// kernel: yolo_forward.4
= control target key start
LH: loop header
LB: loop body
LE: loop exit
PB: predicated region body
PF: predicated region fallthrough
CT: control target
= control target key end

     0   :  { %v378_v0 = vmov 0   ;;  %vm106_vm0 = vcmask 1043456   ;;  %vm102_vm1 = vcmask 588800   ;;  %vm148_vm2 = vcmask 130048   ;;  %s547_s2 = inlined_call_operand.vmem [shape: f32[16,1], index: 2, kind: input, shape index: {}]   ;;  %s548_s0 = inlined_call_operand.vmem [shape: bf16[72,128], index: 0, kind: input, shape index: {}]   ;;  %s549_s6 = inlined_call_operand.vmem [shape: f32[24,1], index: 6, kind: input, shape index: {}]   ;;  %s550_s7 = inlined_call_operand.vmem [shape: f32[16,1], index: 7, kind: input, shape index: {}]   ;;  %s551_s1 = inlined_call_operand.vmem [shape: bf16[16,72], index: 1, kind: input, shape index: {}]   ;;  %s552_s8 = inlined_call_operand.vmem [shape: f32[16,1], index: 8, kind: input, shape index: {}]   ;;  %s553_s10 = inlined_call_operand.vmem [shape: f32[16,1], index: 10, kind: input, shape index: {}]   ;;  %s554_s11 = inlined_call_operand.vmem [shape: f32[16,1], index: 11, kind: input, shape index: {}]   ;;  %s555_s9 = inlined_call_operand.vmem [shape: f32[16,1], index: 9, kind: input, shape index: {}]   ;;  %s556_s4 = inlined_call_operand.vmem [shape: f32[16,1], index: 4, kind: input, shape index: {}]   ;;  %s557_s3 = inlined_call_operand.vmem [shape: bf16[16,16], index: 3, kind: input, shape index: {}]   ;;  %s558_s5 = inlined_call_operand.vmem [shape: bf16[24,16], index: 5, kind: input, shape index: {}]   ;;  %s559_s12 = inlined_call_operand.vmem [shape: f32[2,128], index: 12, kind: input, shape index: {}]   ;;  %s560_s14 = inlined_call_operand.vmem [shape: bf16[8,128], index: 14, kind: output, shape index: {1}]   ;;  %s561_s13 = inlined_call_operand.vmem [shape: f32[16,128], index: 13, kind: output, shape index: {0}]  }
   0x1   :  { %367 = vset.pattern.permute.xlu0 %v378_v0  ;;  %v58_v1 = vld [vmem:[%s547_s2] sm:$0xff]  ;;  %369 = vset.pattern.permute.xlu2 %v378_v0  ;;  %v59_v7 = vld [vmem:[%s547_s2 + $0x8] sm:$0xff]  ;;  %v363_v8 = vld [vmem:[%s548_s0 + $0x18] sm:$0xff] }
   0x2   :  { %v57_v2 = vld [vmem:[%s548_s0 + $0x20] sm:$0xf]  ;;  %62 = vperm.xlu0 %367, %v58_v1   ;;  %368 = vset.pattern.permute.xlu1 %v378_v0  ;;  %v177_v9 = vld [vmem:[%s549_s6 + $0x8] sm:$0xff]  ;;  %v362_v10 = vld [vmem:[%s548_s0 + $0x10] sm:$0xff] }
   0x3   :  { %v92_v3 = vunpack.c.l.b16 %v57_v2  ;;  %v176_v5 = vld [vmem:[%s549_s6] sm:$0xff]  ;;  %v178_v11 = vld [vmem:[%s549_s6 + $0x10] sm:$0xff]  ;;  %v361_v12 = vld [vmem:[%s548_s0 + $0x8] sm:$0xff] }
   0x4   :  { %181 = vperm.xlu2 %369, %v176_v5   ;;  %v227_v13 = vld [vmem:[%s550_s7 + $0x8] sm:$0xff]  ;;  %v360_v14 = vld [vmem:[%s548_s0] sm:$0xff] }
   0x5   :  { %v97_v4 = vpack.c.b16 %v92_v3, %v92_v3  ;;  %v359_v15 = vld [vmem:[%s551_s1] sm:$0xff]  ;;  %v233_v18 = vld [vmem:[%s553_s10 + $0x8] sm:$0xff] }
   0x6   :  { %v228_v16 = vld [vmem:[%s552_s8] sm:$0xff]  ;;  %v235_v19 = vld [vmem:[%s554_s11 + $0x8] sm:$0xff] }
   0x7   :  { %v108_v6 = vsel %vm106_vm0, %v97_v4, 0  ;;  %v232_v17 = vld [vmem:[%s553_s10] sm:$0xff]  ;;  %v132_v22 = vld [vmem:[%s556_s4 + $0x8] sm:$0xff] }
   0x8   :  { %113 = vmatpush.bf16.msra.mxu0 %v108_v6  ;;  %v230_v20 = vld [vmem:[%s555_s9] sm:$0xff]  ;;  %v229_v24 = vld [vmem:[%s552_s8 + $0x8] sm:$0xff] }
   0x9   :  { %v131_v21 = vld [vmem:[%s556_s4] sm:$0xff]  ;;  %v231_v26 = vld [vmem:[%s555_s9 + $0x8] sm:$0xff] }
   0xa   :  { %67 = vperm.xlu0 %367, %v59_v7   ;;  %135 = vperm.xlu1 %368, %v131_v21   ;;  %v226_v23 = vld [vmem:[%s550_s7] sm:$0xff]  ;;  %v175_v53 = vld [vmem:[%s558_s5 + $0x8] sm:$0xf] }
   0xb   :  { %v234_v25 = vld [vmem:[%s554_s11] sm:$0xff]  ;;  %v199_v54 = vunpack.c.l.b16 %v175_v53 }
   0xc   :  { %114 = vmatpush.bf16.msra.mxu0 %v363_v8  ;;  %186 = vperm.xlu2 %369, %v177_v9   ;;  %v364_v38 = vld [vmem:[%s557_s3] sm:$0xff] }
   0xd   :  { %v365_v52 = vld [vmem:[%s558_s5] sm:$0xff]  ;;  %v201_v55 = vpack.c.b16 %v199_v54, %v199_v54 }
  0x10   :  { %115 = vmatpush.bf16.msra.mxu0 %v362_v10  ;;  %v236_v10 = vld [vmem:[%s559_s12] sm:$0x3] }
  0x12   :  { %191 = vperm.xlu0 %367, %v178_v11   ;;  %140 = vperm.xlu1 %368, %v132_v22  }
  0x14   :  { %116 = vmatpush.bf16.msra.mxu0 %v361_v12  ;;  %244 = vperm.xlu2 %369, %v227_v13  }
  0x18   :  { %117 = vmatpush.bf16.msra.mxu0 %v360_v14  ;;  %v271_v14 = vperm.slane %v236_v10, 0 }
  0x1a   :  { %259 = vperm.xlu0 %367, %v228_v16   ;;  %239 = vperm.xlu1 %368, %v226_v23  }
  0x1b   :  { %347 = vmatmul.msk.bf16.vlgmr.msra.gmra.mxu0 %vm102_vm1, %v359_v15  ;;  %v284_v15 = vperm.slane %v236_v10, 1 }
  0x1c   :  { %274 = vperm.xlu2 %369, %v232_v17  }
  0x22   :  { %279 = vperm.xlu0 %367, %v233_v18   ;;  %264 = vperm.xlu1 %368, %v229_v24  }
  0x24   :  { %292 = vperm.xlu2 %369, %v235_v19  }
  0x2a   :  { %301 = vperm.xlu0 %367, %v230_v20   ;;  %287 = vperm.xlu1 %368, %v234_v25  }
  0x32   :  { %306 = vperm.xlu1 %368, %v231_v26  }
  0x5e   :  { %v182_v56 = vpop.permute.xlu2 %181 }
  0x66   :  { %v187_v58 = vpop.permute.xlu2 %186 }
  0x6e   :  { %v245_v0 = vpop.permute.xlu2 %244 }
  0x74   :  { %v63_v27 = vpop.permute.xlu0 %62 }
  0x76   :  { %v275_v11 = vpop.permute.xlu2 %274 }
  0x77   :  { %v282_v18 = vmul.f32 %v275_v11, %v271_v14 }
  0x7c   :  { %v68_v30 = vpop.permute.xlu0 %67  ;;  %v136_v39 = vpop.permute.xlu1 %135 }
  0x84   :  { %v141_v43 = vpop.permute.xlu1 %140  ;;  %v192_v57 = vpop.permute.xlu0 %191 }
  0x8c   :  { %v240_v59 = vpop.permute.xlu1 %239  ;;  %v260_v62 = vpop.permute.xlu0 %259 }
  0x8d   :  { %vm267_vm3 = vcmp.gt.f32.partialorder %v260_v62, 0.5 }
  0x94   :  { %v265_v3 = vpop.permute.xlu1 %264  ;;  %v280_v7 = vpop.permute.xlu0 %279 }
  0x95   :  { %vm268_vm4 = vcmp.gt.f32.partialorder %v265_v3, 0.5 }
  0x98   :  { %v119_v28 = vpop.f32.mrf.mxu0 }
  0x99   :  { %v120_v29 = vadd.f32 %v119_v28, %v63_v27 }
  0x9b   :  { %v124_v32 = vmul.f32 0.1, %v120_v29 }
  0x9c   :  { %v288_v16 = vpop.permute.xlu1 %287  ;;  %v302_v24 = vpop.permute.xlu0 %301 }
  0x9d   :  { %v126_v35 = vmax.f32 %v120_v29, %v124_v32  ;;  %v295_v19 = vmul.f32 %v288_v16, %v284_v15  ;;  %v283_v32 = vmul.f32 %v280_v7, %v271_v14 }
  0x9f   :  { %v297_v27 = vadd.f32 %v295_v19, %v282_v18 }
  0xa0   :  { %v121_v31 = vpop.f32.mrf.mxu0 }
  0xa1   :  { %v122_v33 = vadd.f32 %v121_v31, %v68_v30  ;;  %v293_v30 = vpop.permute.xlu2 %292 }
  0xa3   :  { %v125_v34 = vmul.f32 0.1, %v122_v33 }
  0xa5   :  { %v127_v36 = vmax.f32 %v122_v33, %v125_v34  ;;  %v296_v33 = vmul.f32 %v293_v30, %v284_v15 }
  0xa7   :  { %v130_v37 = vpack.c.bf16 %v127_v36, %v126_v35 }
  0xa9   :  { %159 = vmatpush.bf16.msra.mxu1 %v130_v37  ;;  %v298_v37 = vadd.f32 %v296_v33, %v283_v32 }
  0xac   :  { %352 = vmatmul.msk.bf16.vlgmr.msra.gmra.mxu1 %vm148_vm2, %v364_v38 }
 0x129   :  { %v161_v40 = vpop.f32.mrf.mxu1 }
 0x12a   :  { %v162_v41 = vadd.f32 %v161_v40, %v136_v39 }
 0x12c   :  { %v166_v42 = vmul.f32 0.1, %v162_v41 }
 0x12e   :  { %v168_v46 = vmax.f32 %v162_v41, %v166_v42 }
 0x130   :  { %v170_v49 = vadd.f32 %v168_v46, %v126_v35  ;;  %v307_v35 = vpop.permute.xlu1 %306 }
 0x131   :  { %v163_v44 = vpop.f32.mrf.mxu1 }
 0x132   :  { %v164_v45 = vadd.f32 %v163_v44, %v141_v43 }
 0x134   :  { %v167_v47 = vmul.f32 0.1, %v164_v45 }
 0x136   :  { %v169_v48 = vmax.f32 %v164_v45, %v167_v47 }
 0x138   :  { %v171_v50 = vadd.f32 %v169_v48, %v127_v36 }
 0x13a   :  { %v172_v51 = vpack.c.bf16 %v171_v50, %v170_v49 }
 0x13c   :  { %215 = vmatpush.bf16.msra.mxu2 %v172_v51 }
 0x13f   :  { %357 = vmatmul.msk.bf16.vlgmr.msra.gmra.mxu2 %vm148_vm2, %v365_v52 }
 0x14f   :  { %358 = vmatmul.msk.bf16.gmra.mxu2 %vm148_vm2, %v201_v55 }
 0x1c2   :  { %v217_v60 = vpop.f32.mrf.mxu2 }
 0x1c3   :  { %v218_v61 = vadd.f32 %v217_v60, %v182_v56 }
 0x1c5   :  { %v247_v63 = vmul.f32 %v240_v59, %v218_v61 }
 0x1c7   :  { %v249_v1 = vmul.f32 1.442695, %v247_v63 }
 0x1c9   :  { %370 = vpow2.f32 %v249_v1 }
 0x1ca   :  { %v219_v2 = vpop.f32.mrf.mxu2 }
 0x1cb   :  { %v220_v4 = vadd.f32 %v219_v2, %v187_v58 }
 0x1cd   :  { %v248_v5 = vmul.f32 %v245_v0, %v220_v4 }
 0x1cf   :  { %v371_v6 = vpop.eup %370  ;;  %v251_v8 = vmul.f32 1.442695, %v248_v5 }
 0x1d0   :  { %v253_v9 = vadd.f32 1.0, %v371_v6 }
 0x1d1   :  { %372 = vpow2.f32 %v251_v8 }
 0x1d2   :  { %374 = vrcp.f32 %v253_v9  ;;  %v222_v12 = vpop.f32.mrf.mxu2 }
 0x1d3   :  { %v223_v13 = vadd.f32 %v222_v12, %v192_v57 }
 0x1d5   :  { %v315_v17 = vmul.f32 0.1, %v223_v13 }
 0x1d7   :  { %v373_v20 = vpop.eup %372  ;;  %v316_v21 = vmax.f32 %v223_v13, %v315_v17 }
 0x1d8   :  { %v375_v22 = vpop.eup %374  ;;  %v254_v23 = vadd.f32 1.0, %v373_v20 }
 0x1d9   :  { %v269_v25 = vsel %vm267_vm3, %v371_v6, %v375_v22  ;;  %v317_v26 = vpack.c.bf16 %v316_v21, %v316_v21 }
 0x1da   :  { %v309_v28 = vmul.f32 %v302_v24, %v269_v25  ;;  %376 = vrcp.f32 %v254_v23  ;;  %v224_v29 = vpop.f32.mrf.mxu2 }
 0x1db   :  { %318 = vst [vmem:[%s560_s14] sm:$0xf] %v317_v26 }
 0x1dc   :  { %v311_v31 = vadd.f32 %v309_v28, %v297_v27 }
 0x1de   :  { %313 = vst [vmem:[%s561_s13] sm:$0xff] %v311_v31 }
 0x1e0   :  { %v377_v34 = vpop.eup %376 }
 0x1e1   :  { %v270_v36 = vsel %vm268_vm4, %v373_v20, %v377_v34 }
 0x1e2   :  { %v310_v38 = vmul.f32 %v307_v35, %v270_v36 }
 0x1e4   :  { %v312_v39 = vadd.f32 %v310_v38, %v298_v37 }
 0x1e6   :  { %314 = vst [vmem:[%s561_s13 + $0x8] sm:$0xff] %v312_v39 }

// kernel: yolo_forward.5
= control target key start
LH: loop header
LB: loop body
LE: loop exit
PB: predicated region body
PF: predicated region fallthrough
CT: control target
= control target key end

     0   :  { %s939_s17 = smov 0   ;;  %s941_s18 = smov 0   ;;  %s1047_s0 = inlined_call_operand.vmem [shape: bf16[8,512], index: 0, kind: input, shape index: {}]   ;;  %s1048_s1 = inlined_call_operand.vmem [shape: bf16[8,512], index: 1, kind: input, shape index: {}]   ;;  %s1049_s2 = inlined_call_operand.vmem [shape: bf16[16,8], index: 2, kind: input, shape index: {}]   ;;  %s1050_s3 = inlined_call_operand.vmem [shape: bf16[16,8], index: 3, kind: input, shape index: {}]   ;;  %s1051_s4 = inlined_call_operand.vmem [shape: f32[16,1], index: 4, kind: input, shape index: {}]   ;;  %s1052_s5 = inlined_call_operand.vmem [shape: f32[16,1], index: 5, kind: input, shape index: {}]   ;;  %s1053_s6 = inlined_call_operand.vmem [shape: f32[16,1], index: 6, kind: input, shape index: {}]   ;;  %s1054_s7 = inlined_call_operand.vmem [shape: f32[16,1], index: 7, kind: input, shape index: {}]   ;;  %s1055_s8 = inlined_call_operand.vmem [shape: f32[16,1], index: 8, kind: input, shape index: {}]   ;;  %s1056_s9 = inlined_call_operand.vmem [shape: f32[16,1], index: 9, kind: input, shape index: {}]   ;;  %s1057_s10 = inlined_call_operand.vmem [shape: f32[2,512], index: 10, kind: input, shape index: {}]   ;;  %s1058_s11 = inlined_call_operand.vmem [shape: f32[16,512], index: 11, kind: output, shape index: {}]  }
   0x1   :  { %s943_s19 = smov 0  }
   0x2 LB: > { %s952_s20 = sadd.s32 4294967295, %s876_s19   ;;  %s954_s21 = sadd.s32 1, %s876_s19   ;;  %s876_s19 = sphi %s943_s19, %s1062_s19   ;;  %s872_s18 = sphi %s941_s18, %s1061_s18   ;;  %s868_s17 = sphi %s939_s17, %s1060_s17  }
   0x3   : > { %s271_s22 = ssub.s32 %s876_s19, %s954_s21  ;;  %s274_s23 = sadd.s32 1, %s872_s18 }
   0x4   : > { %p272_p0 = scmp.eq.s32.totalorder %s271_s22, 0  ;;  %p284_p1 = scmp.ne.s32.totalorder %s872_s18, %s868_s17 }
   0x5   : > { %p285_p2 = scmp.eq.s32.totalorder %s952_s20, 1  ;;  %p782_p3 = scmp.ge.s32.totalorder %s876_s19, 1 }
   0x6   : > { %s962_s24 = scalar_select %p272_p0, %s872_s18, %s274_s23  }
   0x7   : > { %p964_p4 = por %p285_p2, %p284_p1  ;;  %p360_p5 = scmp.lt.s32.totalorder %s876_s19, 3 }
   0x9   : > { %p361_p6 = pnand %p782_p3, %p360_p5 }
   0xa   : > { %s784_s30 = sshll.u32 (!%p361_p6), %s952_s20, 1 }
   0xb   : > { %364 = sbr.rel (%p361_p6) target bundleno = 211 (0xd3), region = 64  ;;  %p410_p7 = scmp.lt.s32.totalorder (!%p361_p6), %s784_s30, 3 }
  0x10   : > { %v531_v0 = vld [vmem:[%s1051_s4] sm:$0xff]  ;;  %v878_v2 = vmov 0   ;;  %s1064_s30 = smov (!%p410_p7, %s784_s30), 3  ;;  %v532_v6 = vld [vmem:[%s1051_s4 + $0x8] sm:$0xff]  ;;  %vm449_vm0 = vcmask 1043456   ;;  %vm445_vm1 = vcmask 64512  }
  0x11   : > { %v547_v1 = vld [vmem:[%s1052_s5] sm:$0xff]  ;;  %835 = vset.pattern.permute.xlu0 %v878_v2  ;;  %836 = vset.pattern.permute.xlu1 %v878_v2  ;;  %s785_s14 = sshll.u32 %s1064_s30, 2  ;;  %v548_v11 = vld [vmem:[%s1052_s5 + $0x8] sm:$0xff]  ;;  %s789_s23 = sshll.u32 %s1064_s30, 1 }
  0x12   : > { %535 = vperm.xlu0 %835, %v531_v0   ;;  %560 = vperm.xlu1 %836, %v547_v1   ;;  %v549_v3 = vld [vmem:[%s1053_s6] sm:$0xff]  ;;  %s419_s19 = scalar_lea.vmem %s1048_s1, %s785_s14  ;;  %s413_s26 = scalar_lea.vmem %s1047_s0, %s785_s14  ;;  %v550_v12 = vld [vmem:[%s1053_s6 + $0x8] sm:$0xff] }
  0x13   : > { %837 = vset.pattern.permute.xlu2 %v878_v2  ;;  %v434_v4 = vld [vmem:[%s419_s19] sm:$0xff]  ;;  %v554_v24 = vld [vmem:[%s1055_s8 + $0x8] sm:$0xff]  ;;  %s425_s28 = scalar_lea.vmem %s1057_s10, %s789_s23  ;;  %s406_s30 = sand.u32 1, %s868_s17  }
  0x14   : > { %590 = vperm.xlu2 %837, %v549_v3   ;;  %v431_v5 = vld [vmem:[%s413_s26] sm:$0xff]  ;;  %v441_v7 = vunpack.c.l.b16 %v434_v4  ;;  %v442_v8 = vunpack.c.h.b16 %v434_v4  ;;  %v556_v26 = vld [vmem:[%s1056_s9 + $0x8] sm:$0xff]  ;;  %s783_s29 = sshll.u32 %s406_s30, 5  ;;  %s809_s12 = sshll.u32 (%p964_p4), %s952_s20, 4 }
  0x15   : > { %v490_v9 = vunpack.c.l.b16 %v431_v5  ;;  %v491_v10 = vunpack.c.h.b16 %v431_v5  ;;  %v808_v21 = vld [vmem:[%s1050_s3] sm:$0xff]  ;;  %v552_v28 = vld [vmem:[%s1054_s7 + $0x8] sm:$0xff]  ;;  %s408_s17 = scalar_lea.vmem [#allocation2], %s783_s29  ;;  %s680_s14 = scalar_lea.vmem (%p964_p4), %s1058_s11, %s809_s12 }
  0x16   : > { %v443_v13 = vpack.c.b16 %v441_v7, %v441_v7  ;;  %v444_v14 = vpack.c.b16 %v442_v8, %v442_v8  ;;  %v807_v22 = vld [vmem:[%s1049_s2] sm:$0xff] }
  0x17   : > { %v492_v15 = vpack.c.b16 %v490_v9, %v490_v9  ;;  %v493_v16 = vpack.c.b16 %v491_v10, %v491_v10  ;;  %v553_v23 = vld [vmem:[%s1055_s8] sm:$0xff] }
  0x18   : > { %v451_v17 = vsel %vm449_vm0, %v443_v13, 0  ;;  %v454_v18 = vsel %vm449_vm0, %v444_v14, 0  ;;  %v555_v25 = vld [vmem:[%s1056_s9] sm:$0xff] }
  0x19   : > { %v498_v19 = vsel %vm449_vm0, %v492_v15, 0  ;;  %v501_v20 = vsel %vm449_vm0, %v493_v16, 0  ;;  %463 = vmatpush.bf16.msra.mxu0 %v451_v17  ;;  %477 = vmatpush.bf16.msra.mxu1 %v454_v18  ;;  %v551_v27 = vld [vmem:[%s1054_s7] sm:$0xff] }
  0x1a   : > { %540 = vperm.xlu0 %835, %v532_v6   ;;  %565 = vperm.xlu1 %836, %v548_v11   ;;  %v557_v53 = vld [vmem:[%s425_s28] sm:$0xf] }
  0x1b   : > { %510 = vmatpush.bf16.msra.mxu2 %v498_v19  ;;  %524 = vmatpush.bf16.msra.mxu3 %v501_v20  ;;  %v605_v58 = vperm.slane %v557_v53, 0  ;;  %v625_v59 = vperm.slane %v557_v53, 1  ;;  %v606_v61 = vperm.slane %v557_v53, 2  ;;  %v626_v63 = vperm.slane %v557_v53, 3 }
  0x1c   : > { %595 = vperm.xlu2 %837, %v550_v12   ;;  %794 = vmatmul.msk.bf16.vlgmr.msra.gmra.mxu0 %vm445_vm1, %v808_v21 }
  0x1d   : > { %795 = vmatmul.msk.bf16.vlgmr.msra.gmra.mxu1 %vm445_vm1, %v808_v21  ;;  %v609_v6 = vperm.slane %v605_v58, 0  ;;  %v629_v7 = vperm.slane %v625_v59, 1  ;;  %v610_v8 = vperm.slane %v606_v61, 0  ;;  %v630_v10 = vperm.slane %v626_v63, 1 }
  0x1e   : > { %800 = vmatmul.msk.bf16.vlgmr.msra.gmra.mxu2 %vm445_vm1, %v807_v22  ;;  %801 = vmatmul.msk.bf16.vlgmr.msra.gmra.mxu3 %vm445_vm1, %v807_v22 }
  0x22   : > { %613 = vperm.xlu0 %835, %v553_v23   ;;  %618 = vperm.xlu1 %836, %v554_v24  }
  0x24   : > { %633 = vperm.xlu2 %837, %v555_v25  }
  0x2a   : > { %638 = vperm.xlu0 %835, %v556_v26   ;;  %651 = vperm.xlu1 %836, %v551_v27  }
  0x2c   : > { %656 = vperm.xlu2 %837, %v552_v28  }
  0x6e   : > { %v1020_v33 = vpop.permute.xlu2 %590 }
  0x6f   : > { %vm598_vm2 = vcmp.gt.f32.partialorder %v1020_v33, 0.5 }
  0x76   : > { %v1026_v50 = vpop.permute.xlu2 %595 }
  0x77   : > { %vm599_vm3 = vcmp.gt.f32.partialorder %v1026_v50, 0.5 }
  0x7e   : > { %v634_v9 = vpop.permute.xlu2 %633 }
  0x7f   : > { %v641_v12 = vmul.f32 %v634_v9, %v629_v7  ;;  %v642_v15 = vmul.f32 %v634_v9, %v630_v10 }
  0x84   : > { %v561_v29 = vpop.permute.xlu1 %560  ;;  %v536_v30 = vpop.permute.xlu0 %535 }
  0x8c   : > { %v566_v40 = vpop.permute.xlu1 %565  ;;  %v541_v43 = vpop.permute.xlu0 %540 }
  0x94   : > { %v619_v62 = vpop.permute.xlu1 %618  ;;  %v614_v4 = vpop.permute.xlu0 %613 }
  0x95   : > { %v621_v11 = vmul.f32 %v614_v4, %v609_v6  ;;  %v622_v14 = vmul.f32 %v614_v4, %v610_v8 }
  0x97   : > { %v645_v22 = vadd.f32 %v641_v12, %v621_v11  ;;  %v646_v25 = vadd.f32 %v642_v15, %v622_v14 }
  0x99   : > { %v465_v31 = vpop.f32.mrf.mxu0 }
  0x9a   : > { %v479_v32 = vpop.f32.mrf.mxu1 }
  0x9c   : > { %v652_v19 = vpop.permute.xlu1 %651  ;;  %v639_v26 = vpop.permute.xlu0 %638 }
  0xa1   : > { %v512_v34 = vpop.f32.mrf.mxu2  ;;  %v526_v35 = vpop.f32.mrf.mxu3 }
  0xa2   : > { %v513_v36 = vadd.f32 %v512_v34, %v465_v31  ;;  %v527_v37 = vadd.f32 %v526_v35, %v479_v32  ;;  %v467_v46 = vpop.f32.mrf.mxu0  ;;  %v481_v47 = vpop.f32.mrf.mxu1  ;;  %v623_v31 = vmul.f32 %v619_v62, %v609_v6  ;;  %v643_v32 = vmul.f32 %v639_v26, %v629_v7 }
  0xa3   : > { %v624_v34 = vmul.f32 %v619_v62, %v610_v8  ;;  %v644_v35 = vmul.f32 %v639_v26, %v630_v10 }
  0xa4   : > { %v543_v38 = vadd.f32 %v536_v30, %v513_v36  ;;  %v544_v39 = vadd.f32 %v536_v30, %v527_v37  ;;  %v657_v36 = vpop.permute.xlu2 %656 }
  0xa6   : > { %v568_v41 = vmul.f32 %v561_v29, %v543_v38  ;;  %v569_v42 = vmul.f32 %v561_v29, %v544_v39  ;;  %v647_v38 = vadd.f32 %v643_v32, %v623_v31 }
  0xa8   : > { %v572_v44 = vmul.f32 1.442695, %v568_v41  ;;  %v574_v45 = vmul.f32 1.442695, %v569_v42 }
  0xa9   : > { %v514_v48 = vpop.f32.mrf.mxu2  ;;  %v528_v49 = vpop.f32.mrf.mxu3 }
  0xaa   : > { %838 = vpow2.f32 %v572_v44  ;;  %v515_v51 = vadd.f32 %v514_v48, %v467_v46  ;;  %v529_v52 = vadd.f32 %v528_v49, %v481_v47 }
  0xab   : > { %840 = vpow2.f32 %v574_v45 }
  0xac   : > { %v545_v54 = vadd.f32 %v541_v43, %v515_v51  ;;  %v546_v55 = vadd.f32 %v541_v43, %v529_v52  ;;  %v648_v43 = vadd.f32 %v644_v35, %v624_v34 }
  0xae   : > { %v570_v56 = vmul.f32 %v566_v40, %v545_v54  ;;  %v571_v57 = vmul.f32 %v566_v40, %v546_v55 }
  0xb0   : > { %v839_v60 = vpop.eup %838  ;;  %v576_v0 = vmul.f32 1.442695, %v570_v56  ;;  %v578_v3 = vmul.f32 1.442695, %v571_v57 }
  0xb1   : > { %v841_v1 = vpop.eup %840  ;;  %v580_v2 = vadd.f32 1.0, %v839_v60 }
  0xb2   : > { %v581_v5 = vadd.f32 1.0, %v841_v1  ;;  %842 = vpow2.f32 %v576_v0 }
  0xb3   : > { %844 = vrcp.f32 %v580_v2 }
  0xb4   : > { %846 = vrcp.f32 %v581_v5 }
  0xb5   : > { %848 = vpow2.f32 %v578_v3 }
  0xb8   : > { %v843_v13 = vpop.eup %842 }
  0xb9   : > { %v845_v16 = vpop.eup %844  ;;  %v582_v17 = vadd.f32 1.0, %v843_v13 }
  0xba   : > { %v847_v18 = vpop.eup %846  ;;  %v600_v20 = vsel %vm598_vm2, %v839_v60, %v845_v16 }
  0xbb   : > { %v849_v21 = vpop.eup %848  ;;  %v601_v23 = vsel %vm598_vm2, %v841_v1, %v847_v18  ;;  %v659_v24 = vmul.f32 %v652_v19, %v600_v20  ;;  %850 = vrcp.f32 %v582_v17 }
  0xbc   : > { %v660_v27 = vmul.f32 %v652_v19, %v601_v23  ;;  %v583_v28 = vadd.f32 1.0, %v849_v21 }
  0xbd   : > { %v663_v29 = vadd.f32 %v659_v24, %v645_v22 }
  0xbe   : > { %v664_v30 = vadd.f32 %v660_v27, %v646_v25  ;;  %852 = vrcp.f32 %v583_v28 }
  0xbf   : > { %667 = vst [vmem:[%s408_s17] sm:$0xff] %v663_v29 }
  0xc0   : > { %668 = vst [vmem:[%s408_s17 + $0x8] sm:$0xff] %v664_v30 }
  0xc1   : > { %v851_v33 = vpop.eup %850 }
  0xc2   : > { %v602_v37 = vsel %vm599_vm3, %v843_v13, %v851_v33 }
  0xc3   : > { %v661_v39 = vmul.f32 %v657_v36, %v602_v37 }
  0xc4   : > { %v853_v40 = vpop.eup %852 }
  0xc5   : > { %v603_v41 = vsel %vm599_vm3, %v849_v21, %v853_v40  ;;  %v665_v42 = vadd.f32 %v661_v39, %v647_v38 }
  0xc6   : > { %v662_v44 = vmul.f32 %v657_v36, %v603_v41  ;;  %677 = sbr.rel (!%p964_p4) target bundleno = 211 (0xd3), region = 68  ;;  %v693_v46 = vld [vmem:[%s408_s17] sm:$0xff] (%p964_p4) }
  0xc7   : > { %669 = vst [vmem:[%s408_s17 + $0x10] sm:$0xff] %v665_v42  ;;  %v695_v47 = vld [vmem:[%s408_s17 + $0x8] sm:$0xff] (%p964_p4) }
  0xc8   : > { %v666_v45 = vadd.f32 %v662_v44, %v648_v43  ;;  %694 = vst [vmem:[%s680_s14] sm:$0xff] (%p964_p4), %v693_v46 }
  0xc9   : > { %696 = vst [vmem:[%s680_s14 + $0x8] sm:$0xff] (%p964_p4), %v695_v47 }
  0xca   : > { %670 = vst [vmem:[%s408_s17 + $0x18] sm:$0xff] %v666_v45 }
  0xce   : > { %v697_v48 = vld [vmem:[%s408_s17 + $0x10] sm:$0xff] }
  0xcf   : > { %698 = vst [vmem:[%s680_s14 + $0x20] sm:$0xff] %v697_v48 }
  0xd1   : > { %v699_v49 = vld [vmem:[%s408_s17 + $0x18] sm:$0xff] }
  0xd2   : > { %700 = vst [vmem:[%s680_s14 + $0x28] sm:$0xff] %v699_v49 }
  0xd3 PF: > { %p18_p8 = scmp.ge.s32.totalorder %s954_s21, 4   ;;  %s1060_s17 = smov %s872_s18 }
  0xd4   : > { %s1061_s18 = smov %s962_s24  ;;  %s1062_s19 = smov %s954_s21 }
  0xd5   :  { %20 = sbr.rel (!%p18_p8) target bundleno = 2 (0x2), region = 123 }

</bundles_post_ra>
